<compile_context>
chip_gen: v6e
topology: v6e:2x2x1
jax: 0.10.0
libtpu: 0.0.40
codegen_flags: <defaults>
</compile_context>

<pallas_src>
import functools

import jax
import jax.numpy as jnp
from jax.experimental import pallas as pl
from jax.experimental.pallas import tpu as pltpu

LANE = 128
SUBLANE = 8


def _round_up(n, m):
    return ((n + m - 1) // m) * m


def _cdiv(a, b):
    return (a + b - 1) // b


@functools.lru_cache(maxsize=1)
def _vmem_capacity_bytes():
    """Per-core physical VMEM (128 MiB on v5e/v6e, 64 MiB on v7x)."""
    try:
        return int(pltpu.get_tpu_info().vmem_capacity_bytes)
    except Exception:
        return 128 << 20


def prepare_params(w1, b1, w2, b2, w3, b3):
    """One-time parameter prep, hoisted out of the per-call path.

    * hidden dim padded up to a 128-lane multiple (zero rows/cols are inert),
    * weights cast to bf16 (native MXU dtype), biases kept f32,
    * input / output feature dims left UNPADDED so the streamed x / out HBM
      traffic carries only real data.
    Weights are stored transposed vs. PyTorch: (in_features, out_features).
    """
    num_inputs, hidden = w1.shape
    num_outputs = w3.shape[1]
    h_p = max(_round_up(hidden, LANE), LANE)
    pad_h = h_p - hidden

    bf16 = jnp.bfloat16
    w1_p = jnp.pad(w1, ((0, 0), (0, pad_h))).astype(bf16)       # (in,  h_p)
    w2_p = jnp.pad(w2, ((0, pad_h), (0, pad_h))).astype(bf16)   # (h_p, h_p)
    w3_p = jnp.pad(w3, ((0, pad_h), (0, 0))).astype(bf16)       # (h_p, out)
    b1_p = jnp.pad(b1, ((0, 0), (0, pad_h)))                    # (1, h_p) f32
    b2_p = jnp.pad(b2, ((0, 0), (0, pad_h)))                    # (1, h_p) f32
    b3_p = b3                                                   # (1, out) f32
    del num_inputs, num_outputs
    return w1_p, b1_p, w2_p, b2_p, w3_p, b3_p


def mlp_kernel(x_ref, w1_ref, b1_ref, w2_ref, b2_ref, w3_ref, b3_ref, o_ref):
    # Layer 1: cast the streamed f32 x tile to bf16 on-chip (VPU), MXU matmul
    # with f32 accumulation; bias-add / ReLU stay in f32.
    x = x_ref[...].astype(jnp.bfloat16)
    h1 = jnp.dot(x, w1_ref[...], preferred_element_type=jnp.float32)
    h1 = jnp.maximum(h1 + b1_ref[...], 0.0)
    # Layer 2
    h2 = jnp.dot(h1.astype(jnp.bfloat16), w2_ref[...],
                 preferred_element_type=jnp.float32)
    h2 = jnp.maximum(h2 + b2_ref[...], 0.0)
    # Layer 3 (no activation); store at the true output width (masked vst).
    h3 = jnp.dot(h2.astype(jnp.bfloat16), w3_ref[...],
                 preferred_element_type=jnp.float32)
    o_ref[...] = (h3 + b3_ref[...]).astype(o_ref.dtype)


def _pick_batch_tile(B, block_b):
    """Even-sized batch tiles (minimal padding) with >= 2 grid steps when possible."""
    n_steps = max(1, _cdiv(B, block_b))
    # Force at least two grid steps so v7x's second TensorCore gets work under
    # dimension_semantics=("parallel",); costs ~0.35us extra on single-TC chips.
    if n_steps < 2 and B > SUBLANE:
        n_steps = 2
    tb = _round_up(_cdiv(B, n_steps), SUBLANE)
    b_pad = _round_up(max(B, tb), tb)
    return tb, b_pad


@functools.partial(jax.jit, static_argnames=("block_b",))
def mlp_forward(x, w1_p, b1_p, w2_p, b2_p, w3_p, b3_p, *, block_b=None):
    """x: (B, num_inputs) f32; params are the outputs of prepare_params().

    Returns (B, num_outputs) f32.
    """
    B, num_inputs = x.shape
    h_p = w2_p.shape[0]
    num_outputs = w3_p.shape[1]
    assert w1_p.shape == (num_inputs, h_p)
    assert w3_p.shape == (h_p, num_outputs)

    vmem_cap = _vmem_capacity_bytes()
    if block_b is None:
        # Bigger tiles amortize the ~0.35us/step grid overhead; keep them
        # smaller on v7x (64 MiB VMEM, 2 TCs) than on v5e/v6e (128 MiB).
        block_b = 512 if vmem_cap < (100 << 20) else 2048

    tb, b_pad = _pick_batch_tile(B, block_b)
    grid = (b_pad // tb,)

    # Resident-weight footprint guard (hidden is fixed at 32 by the module, so
    # this never trips here; kept for safety if reused with bigger layers).
    resident_bytes = 2 * ((w1_p.size + w2_p.size + w3_p.size) * 2
                          + (b1_p.size + b2_p.size + b3_p.size) * 4)
    if resident_bytes > vmem_cap // 4:
        # TODO(synk): fall back to a K-tiled grid ("arbitrary" axis + f32 VMEM
        # accumulator) instead of keeping all three weight matrices resident.
        raise NotImplementedError(
            "hidden layer too large for the resident-weight MLP kernel")

    # Rough VMEM budget: double-buffered x/out tiles + f32 intermediates +
    # resident weights.  Cap the scoped request at 60% of physical VMEM
    # (~38 MiB on v7x) so the compiler keeps headroom for scratch/spill.
    block_bytes = (2 * tb * num_inputs * 4        # double-buffered x tile (f32)
                   + 2 * tb * num_outputs * 4     # double-buffered out tile (f32)
                   + 2 * tb * h_p * 4             # h1 / h2 intermediates (f32)
                   + resident_bytes)
    vmem_limit = int(min(max(4 * block_bytes, 8 << 20), int(vmem_cap * 0.6)))

    # Pad only the batch dim, only when needed (no lane padding of x in HBM).
    x_in = jnp.pad(x, ((0, b_pad - B), (0, 0))) if b_pad != B else x

    flops = 2 * b_pad * (num_inputs * h_p + h_p * h_p + h_p * num_outputs)
    bytes_accessed = (x_in.size * 4
                      + (w1_p.size + w2_p.size + w3_p.size) * 2
                      + (b1_p.size + b2_p.size + b3_p.size) * 4
                      + b_pad * num_outputs * 4)

    out = pl.pallas_call(
        mlp_kernel,
        out_shape=jax.ShapeDtypeStruct((b_pad, num_outputs), jnp.float32),
        grid_spec=pltpu.PrefetchScalarGridSpec(
            num_scalar_prefetch=0,
            grid=grid,
            in_specs=[
                # Streamed x tile: full-extent (unpadded) last dim, pipelined
                # along the batch grid.
                pl.BlockSpec((tb, num_inputs), lambda i: (i, 0)),
                # Weights/biases: constant index_map -> VMEM resident, the
                # pipeline skips re-DMA when the block index repeats.
                pl.BlockSpec((num_inputs, h_p), lambda i: (0, 0)),   # w1
                pl.BlockSpec((1, h_p), lambda i: (0, 0)),            # b1
                pl.BlockSpec((h_p, h_p), lambda i: (0, 0)),          # w2
                pl.BlockSpec((1, h_p), lambda i: (0, 0)),            # b2
                pl.BlockSpec((h_p, num_outputs), lambda i: (0, 0)),  # w3
                pl.BlockSpec((1, num_outputs), lambda i: (0, 0)),    # b3
            ],
            # True-width output block (masked store) -> minimal HBM writeback.
            out_specs=pl.BlockSpec((tb, num_outputs), lambda i: (i, 0)),
        ),
        compiler_params=pltpu.CompilerParams(
            dimension_semantics=("parallel",),    # megacore split on v7x
            vmem_limit_bytes=vmem_limit,
        ),
        cost_estimate=pl.CostEstimate(
            flops=flops, transcendentals=0, bytes_accessed=bytes_accessed),
    )(x_in, w1_p, b1_p, w2_p, b2_p, w3_p, b3_p)

    # Only the batch padding (if any) needs slicing off; the feature dim is
    # already the true num_outputs width.
    return out[:B] if b_pad != B else out


def init_params(key, num_inputs, num_outputs, hidden=32):
    """Deterministic init mimicking nn.Linear's uniform(+-1/sqrt(fan_in)) init.

    Weights are stored transposed relative to PyTorch: (in_features, out_features).
    Biases are (1, out) rows so they broadcast cleanly on the lane axis.
    """
    ks = jax.random.split(key, 6)

    def linear(kw, kb, fan_in, fan_out):
        bound = 1.0 / jnp.sqrt(float(fan_in))
        w = jax.random.uniform(kw, (fan_in, fan_out), jnp.float32, -bound, bound)
        b = jax.random.uniform(kb, (1, fan_out), jnp.float32, -bound, bound)
        return w, b

    w1, b1 = linear(ks[0], ks[1], num_inputs, hidden)
    w2, b2 = linear(ks[2], ks[3], hidden, hidden)
    w3, b3 = linear(ks[4], ks[5], hidden, num_outputs)
    return w1, b1, w2, b2, w3, b3


def reference_forward_f32(x, w1, b1, w2, b2, w3, b3):
    h1 = jnp.maximum(x @ w1 + b1, 0.0)
    h2 = jnp.maximum(h1 @ w2 + b2, 0.0)
    return h2 @ w3 + b3


def reference_forward_bf16(x, w1, b1, w2, b2, w3, b3):
    """Same bf16-operand / f32-accumulation recipe as the kernel."""
    bf = jnp.bfloat16
    h1 = jnp.dot(x.astype(bf), w1.astype(bf), preferred_element_type=jnp.float32)
    h1 = jnp.maximum(h1 + b1, 0.0)
    h2 = jnp.dot(h1.astype(bf), w2.astype(bf), preferred_element_type=jnp.float32)
    h2 = jnp.maximum(h2 + b2, 0.0)
    h3 = jnp.dot(h2.astype(bf), w3.astype(bf), preferred_element_type=jnp.float32)
    return h3 + b3


if __name__ == "__main__":
    key = jax.random.PRNGKey(0)
    num_inputs, num_outputs, batch = 16, 8, 64

    kx, kp = jax.random.split(key)
    x = jax.random.normal(kx, (batch, num_inputs), jnp.float32)
    raw_params = init_params(kp, num_inputs, num_outputs, hidden=32)

    # One-time parameter prep (pad hidden to 128 lanes, cast weights to bf16),
    # hoisted out of the per-call jit path.
    prepped = prepare_params(*raw_params)

    # Default (auto) block_b: B=64 still yields a 2-step grid so the batch
    # pipeline / megacore path is exercised.
    out = mlp_forward(x, *prepped)
    out = jax.block_until_ready(out)
    assert out.shape == (batch, num_outputs)

    # Tight check against a reference using the same bf16-operand /
    # f32-accumulation math as the kernel.
    ref_bf16 = reference_forward_bf16(x, *raw_params)
    assert jnp.allclose(out, ref_bf16, atol=5e-3, rtol=5e-3)

    # Loose sanity check against the pure-f32 PyTorch-equivalent math
    # (difference is only bf16 operand rounding).
    ref_f32 = reference_forward_f32(x, *raw_params)
    assert jnp.allclose(out, ref_f32, atol=1e-1, rtol=1e-1)

    print("KERNEL_OK")
</pallas_src>

<mosaic_0001>
module attributes {stable_mosaic.version = 11 : i64} {
  func.func @mlp_kernel(%arg0: i32, %arg1: memref<32x16xf32, #tpu.memory_space<vmem>>, %arg2: memref<16x128xbf16, #tpu.memory_space<vmem>>, %arg3: memref<1x128xf32, #tpu.memory_space<vmem>>, %arg4: memref<128x128xbf16, #tpu.memory_space<vmem>>, %arg5: memref<1x128xf32, #tpu.memory_space<vmem>>, %arg6: memref<128x8xbf16, #tpu.memory_space<vmem>>, %arg7: memref<1x8xf32, #tpu.memory_space<vmem>>, %arg8: memref<32x8xf32, #tpu.memory_space<vmem>>) attributes {dimension_semantics = [#tpu.dimension_semantics<parallel>], iteration_bounds = array<i64: 2>, scalar_prefetch = 0 : i64, scratch_operands = 0 : i64, tpu.core_type = #tpu.core_type<tc>, window_params = [{transform_indices = @transform_0, window_bounds = array<i64: 32, 16>}, {pipeline_mode = #tpu.pipeline_mode<synchronous>, transform_indices = @transform_1, window_bounds = array<i64: 16, 128>}, {pipeline_mode = #tpu.pipeline_mode<synchronous>, transform_indices = @transform_2, window_bounds = array<i64: 1, 128>}, {pipeline_mode = #tpu.pipeline_mode<synchronous>, transform_indices = @transform_3, window_bounds = array<i64: 128, 128>}, {pipeline_mode = #tpu.pipeline_mode<synchronous>, transform_indices = @transform_4, window_bounds = array<i64: 1, 128>}, {pipeline_mode = #tpu.pipeline_mode<synchronous>, transform_indices = @transform_5, window_bounds = array<i64: 128, 8>}, {pipeline_mode = #tpu.pipeline_mode<synchronous>, transform_indices = @transform_6, window_bounds = array<i64: 1, 8>}, {transform_indices = @transform_7, window_bounds = array<i64: 32, 8>}]} {
    %c0 = arith.constant 0 : index
    %c0_0 = arith.constant 0 : index
    %0 = vector.load %arg1[%c0, %c0_0] : memref<32x16xf32, #tpu.memory_space<vmem>>, vector<32x16xf32>
    %1 = arith.truncf %0 : vector<32x16xf32> to vector<32x16xbf16>
    %c0_1 = arith.constant 0 : index
    %c0_2 = arith.constant 0 : index
    %2 = vector.load %arg2[%c0_1, %c0_2] : memref<16x128xbf16, #tpu.memory_space<vmem>>, vector<16x128xbf16>
    %cst = arith.constant dense<0.000000e+00> : vector<32x128xf32>
    %3 = tpu.matmul %1, %2, %cst {dimension_numbers = #tpu.dot_dimension_numbers<[1], [0], [0], [1], [0, 0, 1, 1], [], []>} : vector<32x16xbf16>, vector<16x128xbf16>, vector<32x128xf32> -> vector<32x128xf32>
    %c0_3 = arith.constant 0 : index
    %c0_4 = arith.constant 0 : index
    %4 = vector.load %arg3[%c0_3, %c0_4] : memref<1x128xf32, #tpu.memory_space<vmem>>, vector<1x128xf32>
    %5 = vector.broadcast %4 : vector<1x128xf32> to vector<32x128xf32>
    %6 = arith.addf %3, %5 : vector<32x128xf32>
    %cst_5 = arith.constant 0.000000e+00 : f32
    %7 = vector.broadcast %cst_5 : f32 to vector<32x128xf32>
    %8 = arith.maximumf %6, %7 : vector<32x128xf32>
    %9 = arith.truncf %8 : vector<32x128xf32> to vector<32x128xbf16>
    %c0_6 = arith.constant 0 : index
    %c0_7 = arith.constant 0 : index
    %10 = vector.load %arg4[%c0_6, %c0_7] : memref<128x128xbf16, #tpu.memory_space<vmem>>, vector<128x128xbf16>
    %cst_8 = arith.constant dense<0.000000e+00> : vector<32x128xf32>
    %11 = tpu.matmul %9, %10, %cst_8 {dimension_numbers = #tpu.dot_dimension_numbers<[1], [0], [0], [1], [0, 0, 1, 1], [], []>} : vector<32x128xbf16>, vector<128x128xbf16>, vector<32x128xf32> -> vector<32x128xf32>
    %c0_9 = arith.constant 0 : index
    %c0_10 = arith.constant 0 : index
    %12 = vector.load %arg5[%c0_9, %c0_10] : memref<1x128xf32, #tpu.memory_space<vmem>>, vector<1x128xf32>
    %13 = vector.broadcast %12 : vector<1x128xf32> to vector<32x128xf32>
    %14 = arith.addf %11, %13 : vector<32x128xf32>
    %cst_11 = arith.constant 0.000000e+00 : f32
    %15 = vector.broadcast %cst_11 : f32 to vector<32x128xf32>
    %16 = arith.maximumf %14, %15 : vector<32x128xf32>
    %17 = arith.truncf %16 : vector<32x128xf32> to vector<32x128xbf16>
    %c0_12 = arith.constant 0 : index
    %c0_13 = arith.constant 0 : index
    %18 = vector.load %arg6[%c0_12, %c0_13] : memref<128x8xbf16, #tpu.memory_space<vmem>>, vector<128x8xbf16>
    %cst_14 = arith.constant dense<0.000000e+00> : vector<32x8xf32>
    %19 = tpu.matmul %17, %18, %cst_14 {dimension_numbers = #tpu.dot_dimension_numbers<[1], [0], [0], [1], [0, 0, 1, 1], [], []>} : vector<32x128xbf16>, vector<128x8xbf16>, vector<32x8xf32> -> vector<32x8xf32>
    %c0_15 = arith.constant 0 : index
    %c0_16 = arith.constant 0 : index
    %20 = vector.load %arg7[%c0_15, %c0_16] : memref<1x8xf32, #tpu.memory_space<vmem>>, vector<1x8xf32>
    %21 = vector.broadcast %20 : vector<1x8xf32> to vector<32x8xf32>
    %22 = arith.addf %19, %21 : vector<32x8xf32>
    %c0_17 = arith.constant 0 : index
    %c0_18 = arith.constant 0 : index
    %23 = vector.load %arg8[%c0_17, %c0_18] : memref<32x8xf32, #tpu.memory_space<vmem>>, vector<32x8xf32>
    tpu.vector_store %arg8[%c0_17, %c0_18], %22 {strides = array<i32>} : memref<32x8xf32, #tpu.memory_space<vmem>>, vector<32x8xf32>,
    return
  }
  func.func @transform_0(%arg0: i32) -> (i32, i32) {
    %c0_i32 = arith.constant 0 : i32
    %c0_i32_0 = arith.constant 0 : i32
    return %arg0, %c0_i32 : i32, i32
  }
  func.func @transform_1(%arg0: i32) -> (i32, i32) {
    %c0_i32 = arith.constant 0 : i32
    %c0_i32_0 = arith.constant 0 : i32
    %c0_i32_1 = arith.constant 0 : i32
    return %c0_i32, %c0_i32_0 : i32, i32
  }
  func.func @transform_2(%arg0: i32) -> (i32, i32) {
    %c0_i32 = arith.constant 0 : i32
    %c0_i32_0 = arith.constant 0 : i32
    %c0_i32_1 = arith.constant 0 : i32
    return %c0_i32, %c0_i32_0 : i32, i32
  }
  func.func @transform_3(%arg0: i32) -> (i32, i32) {
    %c0_i32 = arith.constant 0 : i32
    %c0_i32_0 = arith.constant 0 : i32
    %c0_i32_1 = arith.constant 0 : i32
    return %c0_i32, %c0_i32_0 : i32, i32
  }
  func.func @transform_4(%arg0: i32) -> (i32, i32) {
    %c0_i32 = arith.constant 0 : i32
    %c0_i32_0 = arith.constant 0 : i32
    %c0_i32_1 = arith.constant 0 : i32
    return %c0_i32, %c0_i32_0 : i32, i32
  }
  func.func @transform_5(%arg0: i32) -> (i32, i32) {
    %c0_i32 = arith.constant 0 : i32
    %c0_i32_0 = arith.constant 0 : i32
    %c0_i32_1 = arith.constant 0 : i32
    return %c0_i32, %c0_i32_0 : i32, i32
  }
  func.func @transform_6(%arg0: i32) -> (i32, i32) {
    %c0_i32 = arith.constant 0 : i32
    %c0_i32_0 = arith.constant 0 : i32
    %c0_i32_1 = arith.constant 0 : i32
    return %c0_i32, %c0_i32_0 : i32, i32
  }
  func.func @transform_7(%arg0: i32) -> (i32, i32) {
    %c0_i32 = arith.constant 0 : i32
    %c0_i32_0 = arith.constant 0 : i32
    return %arg0, %c0_i32 : i32, i32
  }
}

</mosaic_0001>

<bundles_post_ra>
// kernel: mlp_forward.1
= control target key start
LH: loop header
LB: loop body
LE: loop exit
PB: predicated region body
PF: predicated region fallthrough
CT: control target
= control target key end

     0   :  { %s848_s24 = smov 0   ;;  %s932_s0 = inlined_call_operand.vmem [shape: f32[64,16], index: 0, kind: input, shape index: {}]   ;;  %s933_s1 = inlined_call_operand.vmem [shape: bf16[16,128], index: 1, kind: input, shape index: {}]   ;;  %s934_s2 = inlined_call_operand.vmem [shape: f32[1,128], index: 2, kind: input, shape index: {}]   ;;  %s935_s3 = inlined_call_operand.vmem [shape: bf16[128,128], index: 3, kind: input, shape index: {}]   ;;  %s936_s4 = inlined_call_operand.vmem [shape: f32[1,128], index: 4, kind: input, shape index: {}]   ;;  %s937_s5 = inlined_call_operand.vmem [shape: bf16[128,8], index: 5, kind: input, shape index: {}]   ;;  %s938_s6 = inlined_call_operand.vmem [shape: f32[1,8], index: 6, kind: input, shape index: {}]   ;;  %s939_s7 = inlined_call_operand.vmem [shape: f32[64,8], index: 7, kind: output, shape index: {}]  }
   0x1 LB: > { %s673_s25 = sadd.s32 4294967295, %s806_s24   ;;  %p677_p0 = scmp.ge.s32.totalorder %s806_s24, 1  ;;  %s806_s24 = sphi %s848_s24, %s17_s24  }
   0x2   : > { %p238_p1 = scmp.lt.s32.totalorder %s806_s24, 3 }
   0x4   : > { %p239_p2 = pnand %p677_p0, %p238_p1 }
   0x5   : > { %s678_s28 = sshll.u32 (!%p239_p2), %s673_s25, 2 }
   0x6   : > { %242 = sbr.rel (%p239_p2) target bundleno = 632 (0x278), region = 48  ;;  %p271_p3 = scmp.lt.s32.totalorder (!%p239_p2), %s678_s28, 7 }
   0xb   : > { %v783_v0 = vld [vmem:[%s933_s1] sm:$0xff]   ;;  %v784_v1 = vld [vmem:[%s935_s3 + $0x38] sm:$0xff]   ;;  %s941_s28 = smov (!%p271_p3, %s678_s28), 7  ;;  %v785_v2 = vld [vmem:[%s935_s3 + $0x30] sm:$0xff]   ;;  %vm304_vm0 = vcmask 130048   ;;  %vm612_vm1 = vcmask 64512  }
   0xc   : > { %729 = vmatprep.subr.bf16.mxu0 %v783_v0  ;;  %735 = vmatprep.subr.bf16.mxu1 %v784_v1  ;;  %s679_s10 = sshll.u32 %s941_s28, 3  ;;  %v786_v3 = vld [vmem:[%s935_s3 + $0x28] sm:$0xff]   ;;  %v787_v9 = vld [vmem:[%s935_s3 + $0x20] sm:$0xff]   ;;  %v788_v11 = vld [vmem:[%s935_s3 + $0x18] sm:$0xff]  }
   0xd   : > { %730 = vmatpush3.bf16.msra.mxu0 %v783_v0  ;;  %736 = vmatpush3.bf16.msra.mxu1 %v784_v1  ;;  %s274_s13 = scalar_lea.vmem %s932_s0, %s679_s10  ;;  %v789_v12 = vld [vmem:[%s935_s3 + $0x10] sm:$0xff]   ;;  %v790_v13 = vld [vmem:[%s935_s3 + $0x8] sm:$0xff]   ;;  %v791_v14 = vld [vmem:[%s935_s3] sm:$0xff]   ;;  %s280_s30 = scalar_lea.vmem %s939_s7, %s679_s10 }
   0xe   : > { %737 = vmatprep.subr.bf16.mxu1 %v785_v2  ;;  %v283_v4 = vld [vmem:[%s274_s13] sm:$0xff]  ;;  %v284_v5 = vld [vmem:[%s274_s13 + $0x8] sm:$0xff]  ;;  %v285_v6 = vld [vmem:[%s274_s13 + $0x10] sm:$0xff] }
   0xf   : > { %v287_v7 = vpack.c.bf16 %v284_v5, %v283_v4  ;;  %v286_v8 = vld [vmem:[%s274_s13 + $0x18] sm:$0xff]  ;;  %v793_v16 = vld [vmem:[%s937_s5 + $0x30] sm:$0xff]   ;;  %v794_v17 = vld [vmem:[%s937_s5 + $0x28] sm:$0xff]  }
  0x10   : > { %v288_v10 = vpack.c.bf16 %v286_v8, %v285_v6  ;;  %v792_v15 = vld [vmem:[%s937_s5 + $0x38] sm:$0xff]   ;;  %v795_v18 = vld [vmem:[%s937_s5 + $0x20] sm:$0xff]   ;;  %v797_v35 = vld [vmem:[%s937_s5 + $0x10] sm:$0xff]  }
  0x11   : > { %738 = vmatpush3.bf16.msra.mxu1 %v785_v2  ;;  %731 = vmatprep.mubr.msk.bf16.mxu0 %vm304_vm0, %v287_v7  ;;  %v796_v19 = vld [vmem:[%s937_s5 + $0x18] sm:$0xff]   ;;  %v682_v22 = vld [vmem:[%s934_s2] ss:$0 sm:$0xff]  ;;  %v798_v36 = vld [vmem:[%s937_s5 + $0x8] sm:$0xff]  }
  0x12   : > { %739 = vmatprep.subr.bf16.mxu1 %v786_v3  ;;  %732 = vmatmul.mubr.msk.bf16.vlgmr.msra.gmra.mxu0 %vm304_vm0, %v288_v10  ;;  %v799_v37 = vld [vmem:[%s937_s5] sm:$0xff]  }
  0x13   : > { %755 = vmatprep.subr.bf16.mxu0 %v792_v15  ;;  %v686_v40 = vld [vmem:[%s936_s4] ss:$0 sm:$0xff] }
  0x14   : > { %756 = vmatpush3.bf16.msra.mxu0 %v792_v15  ;;  %v695_v54 = vld [vmem:[%s938_s6] ss:$0 sm:$0xff] }
  0x15   : > { %740 = vmatpush3.bf16.msra.mxu1 %v786_v3  ;;  %757 = vmatprep.subr.bf16.mxu0 %v793_v16 }
  0x16   : > { %741 = vmatprep.subr.bf16.mxu1 %v787_v9 }
  0x18   : > { %758 = vmatpush3.bf16.msra.mxu0 %v793_v16 }
  0x19   : > { %742 = vmatpush3.bf16.msra.mxu1 %v787_v9  ;;  %759 = vmatprep.subr.bf16.mxu0 %v794_v17 }
  0x1a   : > { %743 = vmatprep.subr.bf16.mxu1 %v788_v11 }
  0x1c   : > { %760 = vmatpush3.bf16.msra.mxu0 %v794_v17 }
  0x1d   : > { %744 = vmatpush3.bf16.msra.mxu1 %v788_v11  ;;  %761 = vmatprep.subr.bf16.mxu0 %v795_v18 }
  0x1e   : > { %745 = vmatprep.subr.bf16.mxu1 %v789_v12 }
  0x20   : > { %762 = vmatpush3.bf16.msra.mxu0 %v795_v18 }
  0x21   : > { %746 = vmatpush3.bf16.msra.mxu1 %v789_v12  ;;  %763 = vmatprep.subr.bf16.mxu0 %v796_v19 }
  0x22   : > { %747 = vmatprep.subr.bf16.mxu1 %v790_v13 }
  0x24   : > { %764 = vmatpush3.bf16.msra.mxu0 %v796_v19 }
  0x25   : > { %748 = vmatpush3.bf16.msra.mxu1 %v790_v13  ;;  %765 = vmatprep.subr.bf16.mxu0 %v797_v35 }
  0x26   : > { %749 = vmatprep.subr.bf16.mxu1 %v791_v14 }
  0x28   : > { %766 = vmatpush3.bf16.msra.mxu0 %v797_v35 }
  0x29   : > { %750 = vmatpush3.bf16.msra.mxu1 %v791_v14  ;;  %767 = vmatprep.subr.bf16.mxu0 %v798_v36 }
  0x2c   : > { %768 = vmatpush3.bf16.msra.mxu0 %v798_v36 }
  0x2d   : > { %769 = vmatprep.subr.bf16.mxu0 %v799_v37 }
  0x30   : > { %770 = vmatpush3.bf16.msra.mxu0 %v799_v37 }
  0xd2   : > { %v733_v20 = vpop.f32.mrf.mxu0 }
  0xd3   : > { %v354_v26 = vadd.f32 %v733_v20, %v682_v22 }
  0xd4   : > { %v345_v21 = vpop.f32.mrf.mxu0 }
  0xd5   : > { %v346_v24 = vadd.f32 %v682_v22, %v345_v21  ;;  %v362_v32 = vmax.f32 %v354_v26, 0.0 }
  0xd6   : > { %v734_v23 = vpop.f32.mrf.mxu0 }
  0xd7   : > { %v357_v25 = vadd.f32 %v734_v23, %v682_v22  ;;  %v360_v30 = vmax.f32 %v346_v24, 0.0 }
  0xd8   : > { %v348_v27 = vpop.f32.mrf.mxu0 }
  0xd9   : > { %v349_v28 = vadd.f32 %v682_v22, %v348_v27  ;;  %v363_v29 = vmax.f32 %v357_v25, 0.0 }
  0xdb   : > { %v361_v31 = vmax.f32 %v349_v28, 0.0  ;;  %v365_v34 = vpack.c.bf16 %v363_v29, %v362_v32 }
  0xdd   : > { %v364_v33 = vpack.c.bf16 %v361_v31, %v360_v30 }
  0xdf   : > { %751 = vmatprep.mubr.bf16.mxu1 %v364_v33 }
  0xe0   : > { %752 = vmatmul.mubr.bf16.vlgmr.msra.gmra.mxu1 %v365_v34 }
 0x1a0   : > { %v753_v38 = vpop.f32.mrf.mxu1 }
 0x1a1   : > { %v480_v44 = vadd.f32 %v753_v38, %v686_v40 }
 0x1a2   : > { %v471_v39 = vpop.f32.mrf.mxu1 }
 0x1a3   : > { %v472_v42 = vadd.f32 %v686_v40, %v471_v39  ;;  %v488_v50 = vmax.f32 %v480_v44, 0.0 }
 0x1a4   : > { %v754_v41 = vpop.f32.mrf.mxu1 }
 0x1a5   : > { %v483_v43 = vadd.f32 %v754_v41, %v686_v40  ;;  %v486_v48 = vmax.f32 %v472_v42, 0.0 }
 0x1a6   : > { %v474_v45 = vpop.f32.mrf.mxu1 }
 0x1a7   : > { %v475_v46 = vadd.f32 %v686_v40, %v474_v45  ;;  %v489_v47 = vmax.f32 %v483_v43, 0.0 }
 0x1a9   : > { %v487_v49 = vmax.f32 %v475_v46, 0.0  ;;  %v491_v52 = vpack.c.bf16 %v489_v47, %v488_v50 }
 0x1ab   : > { %v490_v51 = vpack.c.bf16 %v487_v49, %v486_v48 }
 0x1ad   : > { %771 = vmatprep.mubr.bf16.mxu0 %v490_v51 }
 0x1ae   : > { %772 = vmatmul.mubr.bf16.vlgmr.msra.gmra.mxu0 %v491_v52 }
 0x26e   : > { %v773_v53 = vpop.f32.mrf.mxu0 }
 0x26f   : > { %v606_v60 = vadd.f32 %v773_v53, %v695_v54 }
 0x270   : > { %v597_v55 = vpop.f32.mrf.mxu0 }
 0x271   : > { %v598_v56 = vadd.f32 %v695_v54, %v597_v55  ;;  %615 = vst.msk [vmem:[%s280_s30 + $0x10] sm:$0xff] %vm612_vm1, %v606_v60 }
 0x272   : > { %v774_v57 = vpop.f32.mrf.mxu0 }
 0x273   : > { %613 = vst.msk [vmem:[%s280_s30] sm:$0xff] %vm612_vm1, %v598_v56  ;;  %v609_v61 = vadd.f32 %v774_v57, %v695_v54 }
 0x274   : > { %v600_v58 = vpop.f32.mrf.mxu0 }
 0x275   : > { %v601_v59 = vadd.f32 %v695_v54, %v600_v58  ;;  %616 = vst.msk [vmem:[%s280_s30 + $0x18] sm:$0xff] %vm612_vm1, %v609_v61 }
 0x277   : > { %614 = vst.msk [vmem:[%s280_s30 + $0x8] sm:$0xff] %vm612_vm1, %v601_v59 }
 0x278 PF: > { %s17_s24 = sadd.s32 1, %s806_s24  }
 0x279   : > { %p14_p4 = scmp.ge.s32.totalorder %s17_s24, 4  }
 0x27b   :  { %16 = sbr.rel (!%p14_p4) target bundleno = 1 (0x1), region = 78 }

</bundles_post_ra>
